<compile_context>
chip_gen: v7x
topology: tpu7x:2x2x1
jax: 0.10.0
libtpu: 0.0.40
codegen_flags: <defaults>
</compile_context>

<pallas_src>
import functools

import jax
import jax.numpy as jnp
from jax.experimental import pallas as pl
from jax.experimental.pallas import tpu as pltpu

_SUB = 8  # f32 sublane granularity (use 16 if inputs are ever bf16)


def _round_up(x, m):
    return ((x + m - 1) // m) * m


def _mlp_kernel(x_ref, w1_ref, b1_ref, w2_ref, b2_ref, o_ref):
    # Fused Linear -> (Dropout = identity, eval) -> ReLU -> Linear for one
    # batch tile. Small K/N are handled by Mosaic in VMEM; no HBM padding.
    h = jnp.dot(x_ref[...], w1_ref[...],
                preferred_element_type=jnp.float32) + b1_ref[...]
    h = jnp.maximum(h, 0.0)  # ReLU
    y = jnp.dot(h, w2_ref[...],
                preferred_element_type=jnp.float32) + b2_ref[...]
    o_ref[...] = y.astype(o_ref.dtype)


@functools.partial(jax.jit, static_argnames=("block_b", "core_parallel"))
def vanilla_approximator(x, w1, b1, w2, b2, *, block_b=1024,
                         core_parallel=False):
    """Forward pass of VanillaApproximator (eval-mode dropout).

    x:  (B, F) float32, F = arch_in_features + data_in_features
    w1: (F, L)  b1: (1, L)   -- first Linear, stored (in, out)
    w2: (L, L)  b2: (1, L)   -- second Linear, stored (in, out)

    block_b: batch tile size (rows per grid step). ~512-1024 rows hits
    ~85% of the HBM roofline on all generations; VMEM is never binding.
    core_parallel: set True on v7x to split the batch grid across both
    TensorCores (pltpu.CORE_PARALLEL).
    """
    B, F = x.shape
    L = w1.shape[1]
    assert w1.shape == (F, L) and b1.shape == (1, L)
    assert w2.shape == (L, L) and b2.shape == (1, L)

    # Balance batch tiles so the last (possibly ragged) tile never wastes
    # more than ~one tile of work for unlucky B (e.g. B = block_b + 1).
    num_tiles = pl.cdiv(B, block_b)
    tb = min(_round_up(pl.cdiv(B, num_tiles), _SUB), _round_up(B, _SUB))
    if tb >= B:
        tb = B  # block equals the full batch dim -> always a legal block.
    grid = (pl.cdiv(B, tb),)

    batch_sem = pltpu.CORE_PARALLEL if core_parallel else "parallel"

    out = pl.pallas_call(
        _mlp_kernel,
        out_shape=jax.ShapeDtypeStruct((B, L), x.dtype),
        grid_spec=pltpu.PrefetchScalarGridSpec(
            num_scalar_prefetch=0,
            grid=grid,
            in_specs=[
                # x: one batch tile per grid step (double-buffered DMA).
                # Last dim = F equals the full array dim -> legal block.
                pl.BlockSpec((tb, F), lambda i: (i, 0)),
                # Weights / biases: same block every step -> VMEM-resident.
                pl.BlockSpec((F, L), lambda i: (0, 0)),
                pl.BlockSpec((1, L), lambda i: (0, 0)),
                pl.BlockSpec((L, L), lambda i: (0, 0)),
                pl.BlockSpec((1, L), lambda i: (0, 0)),
            ],
            # Narrow (L-wide) output: masked stores in-kernel, but ~12.8x
            # fewer HBM bytes than a 128-lane padded output + slice.
            out_specs=pl.BlockSpec((tb, L), lambda i: (i, 0)),
        ),
        compiler_params=pltpu.CompilerParams(
            dimension_semantics=(batch_sem,),
        ),
    )(x, w1, b1, w2, b2)

    return out


def _init_linear(key, fan_in, fan_out):
    # PyTorch nn.Linear default init: U(-1/sqrt(fan_in), 1/sqrt(fan_in))
    kw, kb = jax.random.split(key)
    bound = 1.0 / jnp.sqrt(float(fan_in))
    w = jax.random.uniform(kw, (fan_in, fan_out), jnp.float32, -bound, bound)
    b = jax.random.uniform(kb, (1, fan_out), jnp.float32, -bound, bound)
    return w, b


if __name__ == "__main__":
    # Small shapes consistent with the module's forward.
    arch_in_features = 16
    data_in_features = 32
    dim_logits = 10            # dim_logits // 10 == 1 -> else branch of __init__
    batch = 8

    F = arch_in_features + data_in_features

    key = jax.random.PRNGKey(0)
    kx, k1, k2 = jax.random.split(key, 3)

    x = jax.random.normal(kx, (batch, F), jnp.float32)
    w1, b1 = _init_linear(k1, F, dim_logits)
    w2, b2 = _init_linear(k2, dim_logits, dim_logits)

    logits = vanilla_approximator(x, w1, b1, w2, b2)
    logits = jax.block_until_ready(logits)

    # Pure-JAX reference (eval-mode dropout = identity).
    ref = jnp.maximum(x @ w1 + b1, 0.0) @ w2 + b2
    assert logits.shape == (batch, dim_logits)
    assert jnp.allclose(logits, ref, atol=1e-5, rtol=1e-5)

    print("KERNEL_OK")
</pallas_src>

<mosaic_0001>
module attributes {stable_mosaic.version = 11 : i64} {
  func.func @_mlp_kernel(%arg0: i32, %arg1: memref<8x48xf32, #tpu.memory_space<vmem>>, %arg2: memref<48x10xf32, #tpu.memory_space<vmem>>, %arg3: memref<1x10xf32, #tpu.memory_space<vmem>>, %arg4: memref<10x10xf32, #tpu.memory_space<vmem>>, %arg5: memref<1x10xf32, #tpu.memory_space<vmem>>, %arg6: memref<8x10xf32, #tpu.memory_space<vmem>>) attributes {dimension_semantics = [#tpu.dimension_semantics<parallel>], iteration_bounds = array<i64: 1>, scalar_prefetch = 0 : i64, scratch_operands = 0 : i64, tpu.core_type = #tpu.core_type<tc>, window_params = [{transform_indices = @transform_0, window_bounds = array<i64: 8, 48>}, {pipeline_mode = #tpu.pipeline_mode<synchronous>, transform_indices = @transform_1, window_bounds = array<i64: 48, 10>}, {pipeline_mode = #tpu.pipeline_mode<synchronous>, transform_indices = @transform_2, window_bounds = array<i64: 1, 10>}, {pipeline_mode = #tpu.pipeline_mode<synchronous>, transform_indices = @transform_3, window_bounds = array<i64: 10, 10>}, {pipeline_mode = #tpu.pipeline_mode<synchronous>, transform_indices = @transform_4, window_bounds = array<i64: 1, 10>}, {transform_indices = @transform_5, window_bounds = array<i64: 8, 10>}]} {
    %c0 = arith.constant 0 : index
    %c0_0 = arith.constant 0 : index
    %0 = vector.load %arg1[%c0, %c0_0] : memref<8x48xf32, #tpu.memory_space<vmem>>, vector<8x48xf32>
    %c0_1 = arith.constant 0 : index
    %c0_2 = arith.constant 0 : index
    %1 = vector.load %arg2[%c0_1, %c0_2] : memref<48x10xf32, #tpu.memory_space<vmem>>, vector<48x10xf32>
    %cst = arith.constant dense<0.000000e+00> : vector<8x10xf32>
    %2 = tpu.matmul %0, %1, %cst {dimension_numbers = #tpu.dot_dimension_numbers<[1], [0], [0], [1], [0, 0, 1, 1], [], []>} : vector<8x48xf32>, vector<48x10xf32>, vector<8x10xf32> -> vector<8x10xf32>
    %c0_3 = arith.constant 0 : index
    %c0_4 = arith.constant 0 : index
    %3 = vector.load %arg3[%c0_3, %c0_4] : memref<1x10xf32, #tpu.memory_space<vmem>>, vector<1x10xf32>
    %4 = vector.broadcast %3 : vector<1x10xf32> to vector<8x10xf32>
    %5 = arith.addf %2, %4 : vector<8x10xf32>
    %cst_5 = arith.constant 0.000000e+00 : f32
    %6 = vector.broadcast %cst_5 : f32 to vector<8x10xf32>
    %7 = arith.maximumf %5, %6 : vector<8x10xf32>
    %c0_6 = arith.constant 0 : index
    %c0_7 = arith.constant 0 : index
    %8 = vector.load %arg4[%c0_6, %c0_7] : memref<10x10xf32, #tpu.memory_space<vmem>>, vector<10x10xf32>
    %cst_8 = arith.constant dense<0.000000e+00> : vector<8x10xf32>
    %9 = tpu.matmul %7, %8, %cst_8 {dimension_numbers = #tpu.dot_dimension_numbers<[1], [0], [0], [1], [0, 0, 1, 1], [], []>} : vector<8x10xf32>, vector<10x10xf32>, vector<8x10xf32> -> vector<8x10xf32>
    %c0_9 = arith.constant 0 : index
    %c0_10 = arith.constant 0 : index
    %10 = vector.load %arg5[%c0_9, %c0_10] : memref<1x10xf32, #tpu.memory_space<vmem>>, vector<1x10xf32>
    %11 = vector.broadcast %10 : vector<1x10xf32> to vector<8x10xf32>
    %12 = arith.addf %9, %11 : vector<8x10xf32>
    %c0_11 = arith.constant 0 : index
    %c0_12 = arith.constant 0 : index
    %13 = vector.load %arg6[%c0_11, %c0_12] : memref<8x10xf32, #tpu.memory_space<vmem>>, vector<8x10xf32>
    tpu.vector_store %arg6[%c0_11, %c0_12], %12 {strides = array<i32>} : memref<8x10xf32, #tpu.memory_space<vmem>>, vector<8x10xf32>,
    return
  }
  func.func @transform_0(%arg0: i32) -> (i32, i32) {
    %c0_i32 = arith.constant 0 : i32
    %c0_i32_0 = arith.constant 0 : i32
    return %arg0, %c0_i32 : i32, i32
  }
  func.func @transform_1(%arg0: i32) -> (i32, i32) {
    %c0_i32 = arith.constant 0 : i32
    %c0_i32_0 = arith.constant 0 : i32
    %c0_i32_1 = arith.constant 0 : i32
    return %c0_i32, %c0_i32_0 : i32, i32
  }
  func.func @transform_2(%arg0: i32) -> (i32, i32) {
    %c0_i32 = arith.constant 0 : i32
    %c0_i32_0 = arith.constant 0 : i32
    %c0_i32_1 = arith.constant 0 : i32
    return %c0_i32, %c0_i32_0 : i32, i32
  }
  func.func @transform_3(%arg0: i32) -> (i32, i32) {
    %c0_i32 = arith.constant 0 : i32
    %c0_i32_0 = arith.constant 0 : i32
    %c0_i32_1 = arith.constant 0 : i32
    return %c0_i32, %c0_i32_0 : i32, i32
  }
  func.func @transform_4(%arg0: i32) -> (i32, i32) {
    %c0_i32 = arith.constant 0 : i32
    %c0_i32_0 = arith.constant 0 : i32
    %c0_i32_1 = arith.constant 0 : i32
    return %c0_i32, %c0_i32_0 : i32, i32
  }
  func.func @transform_5(%arg0: i32) -> (i32, i32) {
    %c0_i32 = arith.constant 0 : i32
    %c0_i32_0 = arith.constant 0 : i32
    return %arg0, %c0_i32 : i32, i32
  }
}

</mosaic_0001>

<bundles_post_ra>
// kernel: vanilla_approximator.1
= control target key start
LH: loop header
LB: loop body
LE: loop exit
PB: predicated region body
PF: predicated region fallthrough
CT: control target
= control target key end

     0   :  { %v291_v3 = vmov 0.0|0.0   ;;  %vm292_vm0 = vmmov 0   ;;  %v293_v6 = vmov 0.0   ;;  %s371_s0 = inlined_call_operand.vmem [shape: f32[8,48], index: 0, kind: input, shape index: {}]   ;;  %s372_s1 = inlined_call_operand.vmem [shape: f32[48,10], index: 1, kind: input, shape index: {}]   ;;  %s373_s2 = inlined_call_operand.vmem [shape: f32[1,10], index: 2, kind: input, shape index: {}]   ;;  %s374_s3 = inlined_call_operand.vmem [shape: f32[10,10], index: 3, kind: input, shape index: {}]   ;;  %s375_s4 = inlined_call_operand.vmem [shape: f32[1,10], index: 4, kind: input, shape index: {}]   ;;  %s376_s5 = inlined_call_operand.hbm [shape: f32[8,10], index: 5, kind: output, shape index: {}]  }
   0x1   :  { %v22_v0 = vld [vmem:[%s372_s1] sm:$0xff]  ;;  %v23_v1 = vld [vmem:[%s372_s1 + $0x8] sm:$0xff]  ;;  %v24_v2 = vld [vmem:[%s372_s1 + $0x10] sm:$0xff]  ;;  %249 = vmatprep.subr.bf16.mxu0 %v291_v3  ;;  %239 = vmatprep.mubr.msk.f32.mxu0 %vm292_vm0, %v293_v6 }
   0x2   :  { %v250_v4 = vpack.c.bf16 %v23_v1, %v22_v0  ;;  %v25_v5 = vld [vmem:[%s372_s1 + $0x18] sm:$0xff]  ;;  %258 = vmatprep.subr.bf16.mxu1 %v291_v3  ;;  %246 = vmatprep.mubr.msk.f32.mxu1 %vm292_vm0, %v293_v6 }
   0x3   :  { %10 = vsyncpa [#allocation3], 0  ;;  %v253_v7 = vpack.c.bf16 %v25_v5, %v24_v2  ;;  %v26_v8 = vld [vmem:[%s372_s1 + $0x20] sm:$0xff]  ;;  %v27_v9 = vld [vmem:[%s372_s1 + $0x28] sm:$0xff]  ;;  %vm35_vm1 = vcmask 392192   ;;  %vm123_vm2 = vcmask 1041408  }
   0x4   :  { %251 = vmatpush3.bf16.msra.mxu0 %v250_v4  ;;  %v256_v10 = vpack.c.bf16 %v27_v9, %v26_v8  ;;  %v21_v11 = vld [vmem:[%s371_s0] sm:$0xff]  ;;  %v111_v13 = vld [vmem:[%s374_s3 + $0x8] sm:$0x3]  ;;  %vm294_vm3 = vmmov 1   ;;  %vm119_vm5 = vcmask 80896  }
   0x5   :  { %252 = vmatprep.subr.bf16.mxu0 %v291_v3  ;;  %v110_v12 = vld [vmem:[%s374_s3] sm:$0xff]  ;;  %vm260_vm4 = vmpackc.low %vm123_vm2, %vm294_vm3  ;;  %s295_s3 = smov [#allocation2]  }
   0x6   :  { %v259_v14 = vpack.c.bf16 %v111_v13, %v110_v12  ;;  %v212_v15 = vld [vmem:[%s373_s2] ss:$0 sm:$0xff]  ;;  %s204_s13 = sshll.u32 %s295_s3, 4  ;;  %s205_s13 = int_to_ptr.vmem [resolvable:$true] %s204_s13 }
   0x7   :  { %v214_v20 = vld [vmem:[%s375_s4] ss:$0 sm:$0xff]  ;;  %s267_s14 = scalar_lea.vmem %s205_s13, 128  ;;  %p272_p1 = scmp.lt.s32.totalorder %s205_s13, %s205_s13 }
   0x8   :  { %254 = vmatpush3.bf16.msra.mxu0 %v253_v7  ;;  %261 = vmatpush3.bf16.msk.msra.mxu1 %vm260_vm4, %v259_v14  ;;  %p268_p0 = scmp.ne.s32.totalorder %s205_s13, %s267_s14  ;;  %p273_p2 = scmp.lt.s32.totalorder %s267_s14, %s267_s14 }
   0x9   :  { %255 = vmatprep.subr.bf16.mxu0 %v291_v3 }
   0xa   :  { %p274_p3 = por %p273_p2, %p272_p1 }
   0xc   :  { %257 = vmatpush3.bf16.msra.mxu0 %v256_v10  ;;  %p275_p4 = pnand %p274_p3, %p268_p0 }
   0xf   :  { %240 = vmatmul.mubr.msk.f32.vlgmr.msra.gmra.mrb[0].mxu0 %vm35_vm1, %v21_v11 }
  0xe2   :  { %v105_v16 = vpop.f32.mrb[0].mxu0 }
  0xe3   :  { %v106_v17 = vadd.f32 %v212_v15, %v105_v16  ;;  %v241_v18 = vpop.f32.mrb[1].mxu0 }
  0xe5   :  { %v109_v19 = vmax.f32 %v106_v17, 0.0 }
  0xe7   :  { %247 = vmatmul.mubr.msk.f32.vlgmr.msra.gmra.mrb[0].mxu1 %vm119_vm5, %v109_v19 }
 0x1ba   :  { %v193_v21 = vpop.f32.mrb[0].mxu1 }
 0x1bb   :  { %v194_v22 = vadd.f32 %v214_v20, %v193_v21  ;;  %v248_v23 = vpop.f32.mrb[1].mxu1 }
 0x1bd   :  { %197 = vst.msk [vmem:[#allocation2] sm:$0xff] %vm119_vm5, %v194_v22 }
 0x1be   :  { %278 = shalt.err (!%p275_p4)
}
 0x1bf   :  { %s279_s16 = scalar_lea.hbm %s376_s5, 128 }
 0x1c0   :  { %p280_p5 = scmp.ne.s32.totalorder %s376_s5, %s279_s16  ;;  %p283_p6 = scmp.lt.u32.totalorder %s279_s16, %s376_s5 }
 0x1c2   :  { %p285_p7 = pnand %p283_p6, %p280_p5 }
 0x1c4   :  { %288 = shalt.err (!%p285_p7)
}
 0x1c5   :  { %207 = dma.vmem_to_hbm [thread:$0]  %s205_s13, 128, %s376_s5, [#allocation3]  }
 0x1c6   :  { %289 = dma.done.wait [#allocation3], 128  }
 0x1c7   :  { %290 = vsyncadd [#allocation3], 4294967168 }
 0x1c8   :  { %211 = vsyncpa [#allocation3], 1 }

</bundles_post_ra>
